<compile_context>
chip_gen: v6e
topology: v6e:2x2x1
jax: 0.10.0
libtpu: 0.0.40
codegen_flags: <defaults>
</compile_context>

<pallas_src>
import jax
import jax.numpy as jnp
from jax.experimental import pallas as pl
from jax.experimental.pallas import tpu as pltpu

PATCH = 8


def _round_up(x, m):
    return ((x + m - 1) // m) * m


def _pick_row_tile(m):
    """Row-tile: large (amortizes ~0.35us/step), multiple of 256, >=2 tiles when m>=512
    so both v7x TensorCores are fed.  Small problems take a single full block."""
    if m > 1024:
        return 1024
    if m >= 512:
        return _round_up(pl.cdiv(m, 2), 256)
    return m


def _patch_embed_kernel(p_ref, w_ref, b_ref, o_ref):
    # p_ref: [tm, K] patch rows; w_ref: [K, Epad] (VMEM-resident across steps);
    # b_ref: [1, Epad] f32; o_ref: [tm, Epad].  One MXU matmul, f32 accumulation.
    acc = jnp.dot(p_ref[...], w_ref[...], preferred_element_type=jnp.float32)
    o_ref[...] = (acc + b_ref[...]).astype(o_ref.dtype)


def patch_embed(x, conv_weight, conv_bias, *, compute_dtype=jnp.bfloat16, out_dtype=None):
    """x: [B, C, H, W]; conv_weight: [E, C, 8, 8] (torch Conv2d layout); conv_bias: [E].
    Returns [B, num_patch, E] == rearrange(conv(x), 'b c h w -> b (h w) c')."""
    B, C, H, W = x.shape
    E = conv_weight.shape[0]
    Ho = (H - PATCH) // PATCH + 1            # VALID conv, stride 8
    Wo = (W - PATCH) // PATCH + 1
    N = Ho * Wo
    K = C * PATCH * PATCH
    M = B * N
    out_dtype = out_dtype if out_dtype is not None else x.dtype

    # --- im2col: single host-side layout pass in the (narrow) compute dtype ------------
    xc = x[:, :, :Ho * PATCH, :Wo * PATCH].astype(compute_dtype)
    p = xc.reshape(B, C, Ho, PATCH, Wo, PATCH)
    p = jnp.transpose(p, (0, 2, 4, 1, 3, 5))             # [B, Ho, Wo, C, ph, pw]
    p = p.reshape(M, K)                                   # row = b*(h*Wo+w), K = (c, ph, pw)

    # --- weights / bias: K-major, lane-dense E (pad E to a multiple of 128) ------------
    Epad = _round_up(E, 128)
    w_t = conv_weight.reshape(E, K).T.astype(compute_dtype)        # [K, E]
    bias = conv_bias.astype(jnp.float32)
    if Epad != E:
        w_t = jnp.pad(w_t, ((0, 0), (0, Epad - E)))
        bias = jnp.pad(bias, (0, Epad - E))
    b2 = bias.reshape(1, Epad)

    # --- tiling / resources --------------------------------------------------------------
    tm = _pick_row_tile(M)
    grid = (pl.cdiv(M, tm),)                              # partial last block masked: no jnp.pad

    csize = jnp.dtype(compute_dtype).itemsize
    osize = jnp.dtype(out_dtype).itemsize
    vmem_need = (2 * tm * K * csize            # double-buffered patch tiles
                 + 2 * tm * Epad * osize       # double-buffered output tiles
                 + 2 * K * Epad * csize        # resident W^T (double-buffered worst case)
                 + 2 * Epad * 4                # bias
                 + tm * Epad * 4)              # f32 accumulator temporary
    vmem_limit = int(min(128 << 20, max(32 << 20, (vmem_need * 5) // 4)))

    cost = pl.CostEstimate(
        flops=2 * M * K * Epad,
        transcendentals=0,
        bytes_accessed=M * K * csize + K * Epad * csize + Epad * 4 + M * Epad * osize)

    out = pl.pallas_call(
        _patch_embed_kernel,
        out_shape=jax.ShapeDtypeStruct((M, Epad), out_dtype),
        grid_spec=pltpu.PrefetchScalarGridSpec(
            num_scalar_prefetch=0,
            grid=grid,
            in_specs=[
                pl.BlockSpec((tm, K), lambda i: (i, 0)),       # patch-row tile
                pl.BlockSpec((K, Epad), lambda i: (0, 0)),     # W^T: constant block, fetched once
                pl.BlockSpec((1, Epad), lambda i: (0, 0)),     # bias
            ],
            out_specs=pl.BlockSpec((tm, Epad), lambda i: (i, 0)),
        ),
        compiler_params=pltpu.CompilerParams(
            dimension_semantics=("parallel",),
            vmem_limit_bytes=vmem_limit),
        cost_estimate=cost,
    )(p, w_t, b2)

    if Epad != E:
        out = out[:, :E]
    return out.reshape(B, N, E)


def _reference(x, conv_weight, conv_bias):
    """Pure-JAX reference mirroring torch: Conv2d(k=8, s=8) then 'b c h w -> b (h w) c'."""
    y = jax.lax.conv_general_dilated(
        x, conv_weight, window_strides=(PATCH, PATCH), padding='VALID',
        dimension_numbers=('NCHW', 'OIHW', 'NCHW'))
    y = y + conv_bias[None, :, None, None]
    B, E, Ho, Wo = y.shape
    return jnp.transpose(y, (0, 2, 3, 1)).reshape(B, Ho * Wo, E)


if __name__ == "__main__":
    # Small shapes consistent with the module: batch=2, channels=4, 16x16 image,
    # embed_dim=32  ->  4 patches of 8x8 per image.
    B, C, H, W, E = 2, 4, 16, 16, 32

    key = jax.random.PRNGKey(0)
    kx, kw, kb = jax.random.split(key, 3)
    x = jax.random.normal(kx, (B, C, H, W), dtype=jnp.float32)
    conv_weight = 0.02 * jax.random.normal(kw, (E, C, PATCH, PATCH), dtype=jnp.float32)
    conv_bias = 0.01 * jax.random.normal(kb, (E,), dtype=jnp.float32)

    ref = _reference(x, conv_weight, conv_bias)

    # Production path: bf16 operands, f32 accumulation.
    out_bf16 = jax.block_until_ready(patch_embed(x, conv_weight, conv_bias))
    assert out_bf16.shape == (B, (H // PATCH) * (W // PATCH), E)
    assert jnp.allclose(out_bf16, ref, atol=1e-2, rtol=1e-2), "bf16 path mismatch vs reference"

    # Full-precision path: exact check against the f32 XLA conv reference.
    out_f32 = jax.block_until_ready(
        patch_embed(x, conv_weight, conv_bias, compute_dtype=jnp.float32))
    assert out_f32.shape == (B, (H // PATCH) * (W // PATCH), E)
    assert jnp.allclose(out_f32, ref, atol=1e-4, rtol=1e-4), "f32 path mismatch vs reference"

    print("KERNEL_OK")
</pallas_src>

<mosaic_0001>
module attributes {stable_mosaic.version = 11 : i64} {
  func.func @_patch_embed_kernel(%arg0: i32, %arg1: memref<8x256xbf16, #tpu.memory_space<vmem>>, %arg2: memref<256x128xbf16, #tpu.memory_space<vmem>>, %arg3: memref<1x128xf32, #tpu.memory_space<vmem>>, %arg4: memref<8x128xf32, #tpu.memory_space<vmem>>) attributes {dimension_semantics = [#tpu.dimension_semantics<parallel>], iteration_bounds = array<i64: 1>, scalar_prefetch = 0 : i64, scratch_operands = 0 : i64, tpu.core_type = #tpu.core_type<tc>, window_params = [{transform_indices = @transform_0, window_bounds = array<i64: 8, 256>}, {pipeline_mode = #tpu.pipeline_mode<synchronous>, transform_indices = @transform_1, window_bounds = array<i64: 256, 128>}, {pipeline_mode = #tpu.pipeline_mode<synchronous>, transform_indices = @transform_2, window_bounds = array<i64: 1, 128>}, {transform_indices = @transform_3, window_bounds = array<i64: 8, 128>}]} {
    %c0 = arith.constant 0 : index
    %c0_0 = arith.constant 0 : index
    %0 = vector.load %arg1[%c0, %c0_0] : memref<8x256xbf16, #tpu.memory_space<vmem>>, vector<8x256xbf16>
    %c0_1 = arith.constant 0 : index
    %c0_2 = arith.constant 0 : index
    %1 = vector.load %arg2[%c0_1, %c0_2] : memref<256x128xbf16, #tpu.memory_space<vmem>>, vector<256x128xbf16>
    %cst = arith.constant dense<0.000000e+00> : vector<8x128xf32>
    %2 = tpu.matmul %0, %1, %cst {dimension_numbers = #tpu.dot_dimension_numbers<[1], [0], [0], [1], [0, 0, 1, 1], [], []>} : vector<8x256xbf16>, vector<256x128xbf16>, vector<8x128xf32> -> vector<8x128xf32>
    %c0_3 = arith.constant 0 : index
    %c0_4 = arith.constant 0 : index
    %3 = vector.load %arg3[%c0_3, %c0_4] : memref<1x128xf32, #tpu.memory_space<vmem>>, vector<1x128xf32>
    %4 = vector.broadcast %3 : vector<1x128xf32> to vector<8x128xf32>
    %5 = arith.addf %2, %4 : vector<8x128xf32>
    %c0_5 = arith.constant 0 : index
    %c0_6 = arith.constant 0 : index
    %6 = vector.load %arg4[%c0_5, %c0_6] : memref<8x128xf32, #tpu.memory_space<vmem>>, vector<8x128xf32>
    tpu.vector_store %arg4[%c0_5, %c0_6], %5 {strides = array<i32>} : memref<8x128xf32, #tpu.memory_space<vmem>>, vector<8x128xf32>,
    return
  }
  func.func @transform_0(%arg0: i32) -> (i32, i32) {
    %c0_i32 = arith.constant 0 : i32
    %c0_i32_0 = arith.constant 0 : i32
    return %arg0, %c0_i32 : i32, i32
  }
  func.func @transform_1(%arg0: i32) -> (i32, i32) {
    %c0_i32 = arith.constant 0 : i32
    %c0_i32_0 = arith.constant 0 : i32
    %c0_i32_1 = arith.constant 0 : i32
    return %c0_i32, %c0_i32_0 : i32, i32
  }
  func.func @transform_2(%arg0: i32) -> (i32, i32) {
    %c0_i32 = arith.constant 0 : i32
    %c0_i32_0 = arith.constant 0 : i32
    %c0_i32_1 = arith.constant 0 : i32
    return %c0_i32, %c0_i32_0 : i32, i32
  }
  func.func @transform_3(%arg0: i32) -> (i32, i32) {
    %c0_i32 = arith.constant 0 : i32
    %c0_i32_0 = arith.constant 0 : i32
    return %arg0, %c0_i32 : i32, i32
  }
}

</mosaic_0001>

<bundles_post_ra>
// kernel: tpu_custom_call.1
= control target key start
LH: loop header
LB: loop body
LE: loop exit
PB: predicated region body
PF: predicated region fallthrough
CT: control target
= control target key end

     0   :  { %8 = vsyncpa [#allocation3], 0  ;;  %s409_s0 = inlined_call_operand.hbm [shape: bf16[8,256], index: 0, kind: input, shape index: {}]   ;;  %s410_s1 = inlined_call_operand.hbm [shape: bf16[256,128], index: 1, kind: input, shape index: {}]   ;;  %s411_s2 = inlined_call_operand.vmem [shape: f32[1,128], index: 2, kind: input, shape index: {}]   ;;  %s412_s3 = inlined_call_operand.hbm [shape: f32[8,128], index: 3, kind: output, shape index: {}]  }
   0x1   :  { %9 = vsyncpa [#allocation6], 0 }
   0x2   :  { %10 = vsyncpa [#allocation4], 0  ;;  %s372_s12 = smov [#allocation2]   ;;  %s373_s14 = smov [#allocation5]  }
   0x3   :  { %s17_s13 = sshll.u32 %s372_s12, 4  ;;  %s26_s15 = sshll.u32 %s373_s14, 4  ;;  %s18_s13 = int_to_ptr.vmem [resolvable:$true] %s17_s13  ;;  %s27_s15 = int_to_ptr.vmem [resolvable:$true] %s26_s15 }
   0x4   :  { %s314_s16 = scalar_lea.vmem %s18_s13, 128  ;;  %p319_p1 = scmp.lt.s32.totalorder %s18_s13, %s18_s13 }
   0x5   :  { %p315_p0 = scmp.ne.s32.totalorder %s18_s13, %s314_s16  ;;  %p320_p2 = scmp.lt.s32.totalorder %s314_s16, %s314_s16 }
   0x7   :  { %p321_p3 = por %p320_p2, %p319_p1 }
   0x9   :  { %p322_p4 = pnand %p321_p3, %p315_p0 }
   0xb   :  { %325 = shalt.err (!%p322_p4)
}
   0xc   :  { %20 = dma.hbm_to_vmem [thread:$0]  %s409_s0, 128, %s18_s13, [#allocation3]  }
   0xd   :  { %s334_s19 = scalar_lea.vmem %s27_s15, 2048  ;;  %p339_p6 = scmp.lt.s32.totalorder %s27_s15, %s27_s15 }
   0xe   :  { %p335_p5 = scmp.ne.s32.totalorder %s27_s15, %s334_s19  ;;  %p340_p7 = scmp.lt.s32.totalorder %s334_s19, %s334_s19 }
  0x10   :  { %p341_p8 = por %p340_p7, %p339_p6 }
  0x12   :  { %p342_p9 = pnand %p341_p8, %p335_p5 }
  0x14   :  { %345 = shalt.err (!%p342_p9)
}
  0x15   :  { %s374_s20 = smov 64   ;;  %s375_s21 = smov 4  }
  0x16   :  { %32 = dma.hbm_to_vmem [thread:$0]  %s410_s1, 2048, %s27_s15, [#allocation6], %s374_s20, %s374_s20, %s375_s21  }
  0x17   :  { %366 = dma.done.wait [#allocation3], 128  }
  0x18   :  { %367 = vsyncadd [#allocation3], 4294967168 }
  0x19   :  { %368 = dma.done.wait [#allocation6], 2048  }
  0x1a   :  { %369 = vsyncadd [#allocation6], 4294965248  ;;  %v288_v0 = vld [vmem:[#allocation5 + $0x78] sm:$0xff]   ;;  %v290_v2 = vld [vmem:[#allocation5 + $0x70] sm:$0xff]   ;;  %s376_s24 = smov [#allocation7]  }
  0x1b   :  { %v289_v1 = vld [vmem:[#allocation5 + $0x38] sm:$0xff]   ;;  %261 = vmatprep.subr.bf16.mxu0 %v288_v0  ;;  %v291_v3 = vld [vmem:[#allocation5 + $0x30] sm:$0xff]   ;;  %v292_v4 = vld [vmem:[#allocation5 + $0x68] sm:$0xff]   ;;  %s232_s25 = sshll.u32 %s376_s24, 4  ;;  %s233_s25 = int_to_ptr.vmem [resolvable:$true] %s232_s25 }
  0x1c   :  { %262 = vmatpush3.bf16.msra.mxu0 %v289_v1  ;;  %v293_v5 = vld [vmem:[#allocation5 + $0x28] sm:$0xff]   ;;  %v294_v6 = vld [vmem:[#allocation5 + $0x60] sm:$0xff]   ;;  %v296_v8 = vld [vmem:[#allocation5 + $0x58] sm:$0xff]   ;;  %s346_s26 = scalar_lea.vmem %s233_s25, 128  ;;  %p351_p11 = scmp.lt.s32.totalorder %s233_s25, %s233_s25 }
  0x1d   :  { %263 = vmatprep.subr.bf16.mxu0 %v290_v2  ;;  %v295_v7 = vld [vmem:[#allocation5 + $0x20] sm:$0xff]   ;;  %v297_v9 = vld [vmem:[#allocation5 + $0x18] sm:$0xff]   ;;  %v298_v10 = vld [vmem:[#allocation5 + $0x50] sm:$0xff]   ;;  %p347_p10 = scmp.ne.s32.totalorder %s233_s25, %s346_s26  ;;  %p352_p12 = scmp.lt.s32.totalorder %s346_s26, %s346_s26 }
  0x1e   :  { %v42_v11 = vld [vmem:[#allocation2] sm:$0xff]  ;;  %v299_v13 = vld [vmem:[#allocation5 + $0x10] sm:$0xff]   ;;  %v300_v14 = vld [vmem:[#allocation5 + $0x48] sm:$0xff]  }
  0x1f   :  { %v244_v12 = vcombine.high %v42_v11, %v42_v11  ;;  %v301_v15 = vld [vmem:[#allocation5 + $0x8] sm:$0xff]   ;;  %v302_v16 = vld [vmem:[#allocation5 + $0x40] sm:$0xff]   ;;  %v243_v18 = vcombine.low %v42_v11, %v42_v11  ;;  %v242_v20 = vld [vmem:[%s411_s2] ss:$0 sm:$0xff]  ;;  %p353_p13 = por %p352_p12, %p351_p11 }
  0x20   :  { %264 = vmatpush3.bf16.msra.mxu0 %v291_v3  ;;  %v303_v17 = vld [vmem:[#allocation5] sm:$0xff]  }
  0x21   :  { %265 = vmatprep.subr.bf16.mxu0 %v292_v4  ;;  %217 = vmatprep.mubr.bf16.mxu0 %v244_v12  ;;  %p354_p0 = pnand %p353_p13, %p347_p10 }
  0x24   :  { %266 = vmatpush3.bf16.msra.mxu0 %v293_v5 }
  0x25   :  { %267 = vmatprep.subr.bf16.mxu0 %v294_v6 }
  0x28   :  { %268 = vmatpush3.bf16.msra.mxu0 %v295_v7 }
  0x29   :  { %269 = vmatprep.subr.bf16.mxu0 %v296_v8 }
  0x2c   :  { %270 = vmatpush3.bf16.msra.mxu0 %v297_v9 }
  0x2d   :  { %271 = vmatprep.subr.bf16.mxu0 %v298_v10 }
  0x30   :  { %272 = vmatpush3.bf16.msra.mxu0 %v299_v13 }
  0x31   :  { %273 = vmatprep.subr.bf16.mxu0 %v300_v14 }
  0x34   :  { %274 = vmatpush3.bf16.msra.mxu0 %v301_v15 }
  0x35   :  { %275 = vmatprep.subr.bf16.mxu0 %v302_v16 }
  0x38   :  { %276 = vmatpush3.bf16.msra.mxu0 %v303_v17 }
  0x3b   :  { %218 = vmatmul.mubr.bf16.vlgmr.msra.gmra.mxu0 %v243_v18 }
  0xfb   :  { %v277_v19 = vpop.f32.mrf.mxu0 }
  0xfd   :  { %v278_v21 = vpop.f32.mrf.mxu0 }
  0xfe   :  { %v279_v22 = vadd.f32 %v278_v21, %v277_v19 }
  0xff   :  { %v280_v23 = vpop.f32.mrf.mxu0 }
 0x100   :  { %v220_v24 = vadd.f32 %v279_v22, %v242_v20 }
 0x101   :  { %v281_v25 = vpop.f32.mrf.mxu0 }
 0x102   :  { %225 = vst [vmem:[#allocation7] sm:$0xff] %v220_v24 }
 0x103   :  { %357 = shalt.err (!%p354_p0)
}
 0x104   :  { %235 = dma.vmem_to_hbm [thread:$0]  %s233_s25, 128, %s412_s3, [#allocation4]  }
 0x105   :  { %370 = dma.done.wait [#allocation4], 128  }
 0x106   :  { %371 = vsyncadd [#allocation4], 4294967168 }
 0x107   :  { %239 = vsyncpa [#allocation3], 1 }
 0x108   :  { %240 = vsyncpa [#allocation6], 1 }
 0x109   :  { %241 = vsyncpa [#allocation4], 1 }

</bundles_post_ra>
